<compile_context>
chip_gen: v7x
topology: tpu7x:2x2x1
jax: 0.10.0
libtpu: 0.0.40
codegen_flags: <defaults>
</compile_context>

<pallas_src>
import functools

import jax
import jax.numpy as jnp
from jax import lax
from jax.experimental import pallas as pl
from jax.experimental.pallas import tpu as pltpu


# ---------------------------------------------------------------------------
# Fused kernel: one batch TILE (Bt batches) per grid step, everything in VMEM.
# ---------------------------------------------------------------------------
def _fused_cross_attention_kernel(
    x_ref, wqkv_ref, wo_ref, bo_ref, o_ref, *, heads, dim_head
):
    bt, n, c = x_ref.shape
    m = bt * n
    dh = dim_head
    g3 = 3 * heads          # q-heads | k-heads | v-heads stacked on the leading axis
    a = heads * bt          # attention "batch" = (head, batch-in-tile)

    # ---- fused q/k/v projections, head-major from the start (no lane slicing) ----
    x2 = x_ref[...].reshape(m, c).astype(jnp.bfloat16)             # (M, C)
    xb = jnp.broadcast_to(x2[None], (g3, m, c))                    # leading-axis broadcast
    qkv = lax.dot_general(                                         # (3H, M, dh) f32
        xb, wqkv_ref[...],
        (((2,), (1,)), ((0,), (0,))),
        preferred_element_type=jnp.float32,
    )

    # (3H, Bt*N, dh) -> (3H*Bt, N, dh): leading-dim regroup only (N % 8 == 0 -> cheap).
    qkv = qkv.reshape(3 * a, n, dh)
    q = qkv[0 * a:1 * a].astype(jnp.bfloat16)                      # (A, N, dh)
    k = qkv[1 * a:2 * a].astype(jnp.bfloat16)                      # scale already folded in
    v = qkv[2 * a:3 * a].astype(jnp.bfloat16)

    # ---- attention per (head, batch) slab; softmax math stays f32 ----
    sim = lax.dot_general(q, k, (((2,), (2,)), ((0,), (0,))),
                          preferred_element_type=jnp.float32)      # (A, N, N)
    sim = sim - jnp.max(sim, axis=-1, keepdims=True)               # stable softmax
    p = jnp.exp(sim)
    inv_denom = 1.0 / jnp.sum(p, axis=-1, keepdims=True)           # exact, only (A, N, 1)
    attn = (p * inv_denom).astype(jnp.bfloat16)
    out = lax.dot_general(attn, v, (((2,), (1,)), ((0,), (0,))),
                          preferred_element_type=jnp.float32)      # (A, N, dh)

    # ---- merge heads + output projection without lane concatenation ----
    out_h = out.reshape(heads, m, dh).astype(jnp.bfloat16)         # (H, M, dh)
    proj = lax.dot_general(out_h, wo_ref[...],
                           (((2,), (1,)), ((0,), (0,))),
                           preferred_element_type=jnp.float32)     # (H, M, C)
    o2 = jnp.sum(proj, axis=0) + bo_ref[...]                       # (M, C) f32

    # TODO(synk): C(=query_dim)=32 < 128 lanes -> masked output stores; pad Wo columns to
    # 128 (and slice in the wrapper) if the store tail matters at production sizes.
    o_ref[...] = o2.reshape(bt, n, c).astype(o_ref.dtype)


# ---------------------------------------------------------------------------
# Wrapper
# ---------------------------------------------------------------------------
def cross_attention_forward(x, params, *, heads, batch_tile=None):
    """x: (B, N, query_dim) float32.  context=None, mask=None path of the module."""
    b, n, c = x.shape
    wq, wk, wv, wo, bo = (
        params["wq"], params["wk"], params["wv"], params["wo"], params["bo"]
    )
    inner = wq.shape[0]                 # inner_dim = heads * dim_head
    dh = inner // heads
    scale = float(dh) ** -0.5

    # Batch tile: amortize the ~0.35us per-grid-step overhead and fill the MXU M-dim,
    # while keeping >1 grid step when B is large (megacore sharding on v7x).
    if batch_tile is None:
        batch_tile = 1
        for t in range(min(b, 8), 0, -1):
            if b % t == 0:
                batch_tile = t
                break
    bt = batch_tile
    assert b % bt == 0, (b, bt)

    # ---- one-time weight repack (constant-folded under jit) ----
    # context == q  =>  k = x @ (Wk Wq).T,  v = x @ (Wv Wq).T : compose once in f32, fold
    # the 1/sqrt(dh) scale into the k weights, and lay everything out head-major.
    wq_t = wq.T.astype(jnp.float32)                                # (C, inner)
    wk_eff = (wq_t @ wk.T.astype(jnp.float32)) * scale             # (C, inner)
    wv_eff = wq_t @ wv.T.astype(jnp.float32)                       # (C, inner)

    def head_major(w):                                             # (C, inner) -> (H, C, dh)
        return w.reshape(c, heads, dh).transpose(1, 0, 2)

    w_qkv = jnp.concatenate(
        [head_major(wq_t), head_major(wk_eff), head_major(wv_eff)], axis=0
    ).astype(jnp.bfloat16)                                         # (3H, C, dh)
    wo_h = wo.T.reshape(heads, dh, c).astype(jnp.bfloat16)         # (H, dh, C)
    bo2 = bo.reshape(1, c).astype(jnp.float32)

    # VMEM budget estimate (double-buffered blocks + resident intermediates), clamped to
    # [16 MiB, 64 MiB] so it is valid on v5e/v6e/v7x.
    m = bt * n
    a = heads * bt
    est = (
        2 * bt * n * c * 4                       # x block (f32, double-buffered)
        + 2 * bt * n * c * 4                     # out block
        + 2 * (w_qkv.size + wo_h.size) * 2 + bo2.size * 4
        + (3 * heads * m * c) * 2                # broadcast x (bf16)
        + (3 * a * n * dh) * (4 + 2)             # qkv f32 + bf16 casts
        + (a * n * n) * (4 + 4 + 2)              # sim, p (f32), attn (bf16)
        + (a * n * dh) * (4 + 2)                 # out f32 + bf16
        + (heads * m * c) * 4                    # proj
        + 2 * m * c * 4                          # o2 / store staging
    )
    vmem_limit = int(min(max(2 * est + (4 << 20), 16 << 20), 64 << 20))

    flops = (2 * b * n * c * 3 * inner           # q/k/v projections
             + 4 * b * heads * n * n * dh        # sim + attn@v
             + 2 * b * n * inner * c)            # output projection
    bytes_accessed = (x.size * 4 + w_qkv.size * 2 + wo_h.size * 2
                      + bo2.size * 4 + b * n * c * 4)
    cost = pl.CostEstimate(flops=flops,
                           transcendentals=b * heads * n * n,
                           bytes_accessed=bytes_accessed)

    kernel = functools.partial(_fused_cross_attention_kernel, heads=heads, dim_head=dh)

    # TODO(synk): for production N (>=1k) add a KV-chunk inner loop with online softmax
    # (flash pattern) so no full (N, N) buffer is materialized (v7x has only 64 MiB VMEM).
    return pl.pallas_call(
        kernel,
        grid=(b // bt,),
        in_specs=[
            pl.BlockSpec((bt, n, c), lambda i: (i, 0, 0)),           # x (per batch tile)
            pl.BlockSpec((3 * heads, c, dh), lambda i: (0, 0, 0)),   # [Wq|Wk_eff|Wv_eff] head-major
            pl.BlockSpec((heads, dh, c), lambda i: (0, 0, 0)),       # Wo head-major
            pl.BlockSpec((1, c), lambda i: (0, 0)),                  # bo
        ],
        out_specs=pl.BlockSpec((bt, n, c), lambda i: (i, 0, 0)),
        out_shape=jax.ShapeDtypeStruct((b, n, c), jnp.float32),
        compiler_params=pltpu.CompilerParams(
            dimension_semantics=("parallel",),                       # shard batch tiles (v7x 2 TCs)
            vmem_limit_bytes=vmem_limit,
        ),
        cost_estimate=cost,
    )(x, w_qkv, wo_h, bo2)


# ---------------------------------------------------------------------------
# Pure-JAX reference (f32) for correctness check
# ---------------------------------------------------------------------------
def cross_attention_reference(x, params, *, heads):
    b, n, _ = x.shape
    wq, wk, wv, wo, bo = (
        params["wq"], params["wk"], params["wv"], params["wo"], params["bo"]
    )
    inner = wq.shape[0]
    dh = inner // heads
    scale = float(dh) ** -0.5

    q = x @ wq.T
    context = q                      # default(context, q) in the module's forward
    k = context @ wk.T
    v = context @ wv.T

    def split(t):
        return t.reshape(b, n, heads, dh).transpose(0, 2, 1, 3).reshape(b * heads, n, dh)

    qh, kh, vh = map(split, (q, k, v))
    sim = jnp.einsum("bid,bjd->bij", qh, kh) * scale
    attn = jax.nn.softmax(sim, axis=-1)
    out = jnp.einsum("bij,bjd->bid", attn, vh)
    out = out.reshape(b, heads, n, dh).transpose(0, 2, 1, 3).reshape(b, n, inner)
    return out @ wo.T + bo


# ---------------------------------------------------------------------------
if __name__ == "__main__":
    B, N = 2, 8
    QUERY_DIM, HEADS, DIM_HEAD = 32, 4, 16
    INNER = HEADS * DIM_HEAD            # 64; context_dim defaults to inner_dim

    key = jax.random.PRNGKey(0)
    kx, kq, kk, kv, ko, kb = jax.random.split(key, 6)

    # Deterministic synthetic parameters (PyTorch Linear weight layout: (out, in)).
    params = {
        "wq": 0.05 * jax.random.normal(kq, (INNER, QUERY_DIM), jnp.float32),
        "wk": 0.05 * jax.random.normal(kk, (INNER, INNER), jnp.float32),
        "wv": 0.05 * jax.random.normal(kv, (INNER, INNER), jnp.float32),
        "wo": 0.05 * jax.random.normal(ko, (QUERY_DIM, INNER), jnp.float32),
        "bo": 0.05 * jax.random.normal(kb, (QUERY_DIM,), jnp.float32),
    }

    x = jax.random.normal(kx, (B, N, QUERY_DIM), jnp.float32)

    out = jax.block_until_ready(cross_attention_forward(x, params, heads=HEADS))
    ref = cross_attention_reference(x, params, heads=HEADS)

    assert out.shape == (B, N, QUERY_DIM), out.shape
    # bf16 MXU operands (f32 accumulation / f32 softmax) -> loosened tolerance vs f32 ref.
    max_err = float(jnp.max(jnp.abs(out - ref)))
    assert jnp.allclose(out, ref, atol=1e-2, rtol=1e-2), max_err

    print("KERNEL_OK")
</pallas_src>

<mosaic_0001>
module attributes {stable_mosaic.version = 11 : i64} {
  func.func @_fused_cross_attention_kernel(%arg0: i32, %arg1: memref<2x8x32xf32, #tpu.memory_space<vmem>>, %arg2: memref<12x32x16xbf16, #tpu.memory_space<vmem>>, %arg3: memref<4x16x32xbf16, #tpu.memory_space<vmem>>, %arg4: memref<1x32xf32, #tpu.memory_space<vmem>>, %arg5: memref<2x8x32xf32, #tpu.memory_space<vmem>>) attributes {dimension_semantics = [#tpu.dimension_semantics<parallel>], iteration_bounds = array<i64: 1>, scalar_prefetch = 0 : i64, scratch_operands = 0 : i64, tpu.core_type = #tpu.core_type<tc>, window_params = [{transform_indices = @transform_0, window_bounds = array<i64: 2, 8, 32>}, {pipeline_mode = #tpu.pipeline_mode<synchronous>, transform_indices = @transform_1, window_bounds = array<i64: 12, 32, 16>}, {pipeline_mode = #tpu.pipeline_mode<synchronous>, transform_indices = @transform_2, window_bounds = array<i64: 4, 16, 32>}, {pipeline_mode = #tpu.pipeline_mode<synchronous>, transform_indices = @transform_3, window_bounds = array<i64: 1, 32>}, {transform_indices = @transform_4, window_bounds = array<i64: 2, 8, 32>}]} {
    %c0 = arith.constant 0 : index
    %c0_0 = arith.constant 0 : index
    %c0_1 = arith.constant 0 : index
    %0 = vector.load %arg1[%c0, %c0_0, %c0_1] : memref<2x8x32xf32, #tpu.memory_space<vmem>>, vector<2x8x32xf32>
    %1 = vector.shape_cast %0 : vector<2x8x32xf32> to vector<16x32xf32>
    %2 = arith.truncf %1 : vector<16x32xf32> to vector<16x32xbf16>
    %3 = vector.shape_cast %2 : vector<16x32xbf16> to vector<1x16x32xbf16>
    %4 = vector.shape_cast %3 : vector<1x16x32xbf16> to vector<1x16x32xbf16>
    %5 = vector.broadcast %4 : vector<1x16x32xbf16> to vector<12x16x32xbf16>
    %c0_2 = arith.constant 0 : index
    %c0_3 = arith.constant 0 : index
    %c0_4 = arith.constant 0 : index
    %6 = vector.load %arg2[%c0_2, %c0_3, %c0_4] : memref<12x32x16xbf16, #tpu.memory_space<vmem>>, vector<12x32x16xbf16>
    %cst = arith.constant dense<0.000000e+00> : vector<12x16x16xf32>
    %7 = tpu.matmul %5, %6, %cst {dimension_numbers = #tpu.dot_dimension_numbers<[2], [1], [1], [2], [0, 0, 0, 1, 1, 2], [0], [0]>} : vector<12x16x32xbf16>, vector<12x32x16xbf16>, vector<12x16x16xf32> -> vector<12x16x16xf32>
    %8 = vector.shape_cast %7 : vector<12x16x16xf32> to vector<24x8x16xf32>
    %9 = vector.extract_strided_slice %8 {offsets = [0, 0, 0], sizes = [8, 8, 16], strides = [1, 1, 1]} : vector<24x8x16xf32> to vector<8x8x16xf32>
    %10 = arith.truncf %9 : vector<8x8x16xf32> to vector<8x8x16xbf16>
    %11 = vector.extract_strided_slice %8 {offsets = [8, 0, 0], sizes = [8, 8, 16], strides = [1, 1, 1]} : vector<24x8x16xf32> to vector<8x8x16xf32>
    %12 = arith.truncf %11 : vector<8x8x16xf32> to vector<8x8x16xbf16>
    %13 = vector.extract_strided_slice %8 {offsets = [16, 0, 0], sizes = [8, 8, 16], strides = [1, 1, 1]} : vector<24x8x16xf32> to vector<8x8x16xf32>
    %14 = arith.truncf %13 : vector<8x8x16xf32> to vector<8x8x16xbf16>
    %cst_5 = arith.constant dense<0.000000e+00> : vector<8x8x8xf32>
    %15 = tpu.matmul %10, %12, %cst_5 {dimension_numbers = #tpu.dot_dimension_numbers<[2], [2], [1], [1], [0, 0, 0, 1, 1, 1], [0], [0]>} : vector<8x8x16xbf16>, vector<8x8x16xbf16>, vector<8x8x8xf32> -> vector<8x8x8xf32>
    %cst_6 = arith.constant dense<0xFF800000> : vector<8x8xf32>
    %16 = vector.multi_reduction <maximumf>, %15, %cst_6 [2] : vector<8x8x8xf32> to vector<8x8xf32>
    %17 = vector.shape_cast %16 : vector<8x8xf32> to vector<8x8x1xf32>
    %18 = vector.broadcast %17 : vector<8x8x1xf32> to vector<8x8x8xf32>
    %19 = arith.subf %15, %18 : vector<8x8x8xf32>
    %20 = math.exp %19 : vector<8x8x8xf32>
    %cst_7 = arith.constant dense<0.000000e+00> : vector<8x8xf32>
    %21 = vector.multi_reduction <add>, %20, %cst_7 [2] : vector<8x8x8xf32> to vector<8x8xf32>
    %22 = vector.shape_cast %21 : vector<8x8xf32> to vector<8x8x1xf32>
    %cst_8 = arith.constant 1.000000e+00 : f32
    %23 = vector.broadcast %cst_8 : f32 to vector<8x8x1xf32>
    %24 = arith.divf %23, %22 : vector<8x8x1xf32>
    %25 = vector.broadcast %24 : vector<8x8x1xf32> to vector<8x8x8xf32>
    %26 = arith.mulf %20, %25 : vector<8x8x8xf32>
    %27 = arith.truncf %26 : vector<8x8x8xf32> to vector<8x8x8xbf16>
    %cst_9 = arith.constant dense<0.000000e+00> : vector<8x8x16xf32>
    %28 = tpu.matmul %27, %14, %cst_9 {dimension_numbers = #tpu.dot_dimension_numbers<[2], [1], [1], [2], [0, 0, 0, 1, 1, 2], [0], [0]>} : vector<8x8x8xbf16>, vector<8x8x16xbf16>, vector<8x8x16xf32> -> vector<8x8x16xf32>
    %29 = vector.shape_cast %28 : vector<8x8x16xf32> to vector<4x16x16xf32>
    %30 = arith.truncf %29 : vector<4x16x16xf32> to vector<4x16x16xbf16>
    %c0_10 = arith.constant 0 : index
    %c0_11 = arith.constant 0 : index
    %c0_12 = arith.constant 0 : index
    %31 = vector.load %arg3[%c0_10, %c0_11, %c0_12] : memref<4x16x32xbf16, #tpu.memory_space<vmem>>, vector<4x16x32xbf16>
    %cst_13 = arith.constant dense<0.000000e+00> : vector<4x16x32xf32>
    %32 = tpu.matmul %30, %31, %cst_13 {dimension_numbers = #tpu.dot_dimension_numbers<[2], [1], [1], [2], [0, 0, 0, 1, 1, 2], [0], [0]>} : vector<4x16x16xbf16>, vector<4x16x32xbf16>, vector<4x16x32xf32> -> vector<4x16x32xf32>
    %cst_14 = arith.constant dense<0.000000e+00> : vector<16x32xf32>
    %33 = vector.multi_reduction <add>, %32, %cst_14 [0] : vector<4x16x32xf32> to vector<16x32xf32>
    %c0_15 = arith.constant 0 : index
    %c0_16 = arith.constant 0 : index
    %34 = vector.load %arg4[%c0_15, %c0_16] : memref<1x32xf32, #tpu.memory_space<vmem>>, vector<1x32xf32>
    %35 = vector.broadcast %34 : vector<1x32xf32> to vector<16x32xf32>
    %36 = arith.addf %33, %35 : vector<16x32xf32>
    %37 = vector.shape_cast %36 : vector<16x32xf32> to vector<2x8x32xf32>
    %c0_17 = arith.constant 0 : index
    %c0_18 = arith.constant 0 : index
    %c0_19 = arith.constant 0 : index
    %38 = vector.load %arg5[%c0_17, %c0_18, %c0_19] : memref<2x8x32xf32, #tpu.memory_space<vmem>>, vector<2x8x32xf32>
    tpu.vector_store %arg5[%c0_17, %c0_18, %c0_19], %37 {strides = array<i32>} : memref<2x8x32xf32, #tpu.memory_space<vmem>>, vector<2x8x32xf32>,
    return
  }
  func.func @transform_0(%arg0: i32) -> (i32, i32, i32) {
    %c0_i32 = arith.constant 0 : i32
    %c0_i32_0 = arith.constant 0 : i32
    %c0_i32_1 = arith.constant 0 : i32
    return %arg0, %c0_i32, %c0_i32_0 : i32, i32, i32
  }
  func.func @transform_1(%arg0: i32) -> (i32, i32, i32) {
    %c0_i32 = arith.constant 0 : i32
    %c0_i32_0 = arith.constant 0 : i32
    %c0_i32_1 = arith.constant 0 : i32
    %c0_i32_2 = arith.constant 0 : i32
    return %c0_i32, %c0_i32_0, %c0_i32_1 : i32, i32, i32
  }
  func.func @transform_2(%arg0: i32) -> (i32, i32, i32) {
    %c0_i32 = arith.constant 0 : i32
    %c0_i32_0 = arith.constant 0 : i32
    %c0_i32_1 = arith.constant 0 : i32
    %c0_i32_2 = arith.constant 0 : i32
    return %c0_i32, %c0_i32_0, %c0_i32_1 : i32, i32, i32
  }
  func.func @transform_3(%arg0: i32) -> (i32, i32) {
    %c0_i32 = arith.constant 0 : i32
    %c0_i32_0 = arith.constant 0 : i32
    %c0_i32_1 = arith.constant 0 : i32
    return %c0_i32, %c0_i32_0 : i32, i32
  }
  func.func @transform_4(%arg0: i32) -> (i32, i32, i32) {
    %c0_i32 = arith.constant 0 : i32
    %c0_i32_0 = arith.constant 0 : i32
    %c0_i32_1 = arith.constant 0 : i32
    return %arg0, %c0_i32, %c0_i32_0 : i32, i32, i32
  }
}

</mosaic_0001>

<bundles_post_ra>
// kernel: tpu_custom_call.1
= control target key start
LH: loop header
LB: loop body
LE: loop exit
PB: predicated region body
PF: predicated region fallthrough
CT: control target
= control target key end

     0   :  { %v2272_v1 = vmov 0.0   ;;  %vm2273_vm0 = vmmov 0   ;;  %vm82_vm1 = vcmask 261120   ;;  %s2641_s0 = inlined_call_operand.vmem [shape: f32[2,8,32], index: 0, kind: input, shape index: {}]   ;;  %s2642_s1 = inlined_call_operand.vmem [shape: bf16[12,32,16], index: 1, kind: input, shape index: {}]   ;;  %s2643_s2 = inlined_call_operand.vmem [shape: bf16[4,16,32], index: 2, kind: input, shape index: {}]   ;;  %s2644_s3 = inlined_call_operand.vmem [shape: f32[1,32], index: 3, kind: input, shape index: {}]   ;;  %s2645_s4 = inlined_call_operand.hbm [shape: f32[2,8,32], index: 4, kind: output, shape index: {}]  }
   0x1   :  { %v2188_v0 = vld [vmem:[%s2642_s1] sm:$0xff]   ;;  %1967 = vmatprep.subr.bf16.mxu0 %v2272_v1  ;;  %v2189_v2 = vld [vmem:[%s2642_s1 + $0x8] sm:$0xff]   ;;  %1975 = vmatprep.subr.bf16.mxu1 %v2272_v1  ;;  %v2190_v3 = vld [vmem:[%s2642_s1 + $0x10] sm:$0xff]  }
   0x2   :  { %1968 = vmatpush3.bf16.msra.mxu0 %v2188_v0  ;;  %1971 = vmatprep.mubr.msk.bf16.mxu0 %vm2273_vm0, %v2272_v1  ;;  %v19_v4 = vld [vmem:[%s2641_s0] sm:$0xff]  ;;  %v20_v5 = vld [vmem:[%s2641_s0 + $0x8] sm:$0xff]  ;;  %v2192_v7 = vld [vmem:[%s2642_s1 + $0x18] sm:$0xff]  }
   0x3   :  { %1969 = vmatprep.subr.bf16.mxu0 %v2272_v1  ;;  %1979 = vmatprep.mubr.msk.bf16.mxu1 %vm2273_vm0, %v2272_v1  ;;  %v2324_v6 = vpack.c.bf16 %v20_v5, %v19_v4  ;;  %v2191_v8 = vld [vmem:[%s2642_s1 + $0x20] sm:$0xff]   ;;  %v2194_v9 = vld [vmem:[%s2642_s1 + $0x30] sm:$0xff]   ;;  %v2193_v10 = vld [vmem:[%s2642_s1 + $0x28] sm:$0xff]  }
   0x4   :  { %1976 = vmatpush3.bf16.msra.mxu1 %v2190_v3  ;;  %v2196_v11 = vld [vmem:[%s2642_s1 + $0x38] sm:$0xff]   ;;  %v2195_v12 = vld [vmem:[%s2642_s1 + $0x40] sm:$0xff]   ;;  %v2198_v13 = vld [vmem:[%s2642_s1 + $0x50] sm:$0xff]  }
   0x5   :  { %1977 = vmatprep.subr.bf16.mxu1 %v2272_v1  ;;  %v2197_v14 = vld [vmem:[%s2642_s1 + $0x48] sm:$0xff]   ;;  %v2199_v15 = vld [vmem:[%s2642_s1 + $0x58] sm:$0xff]   ;;  %v2200_v16 = vld [vmem:[%s2642_s1 + $0x60] sm:$0xff]  }
   0x6   :  { %1970 = vmatpush3.bf16.msra.mxu0 %v2189_v2  ;;  %v2202_v17 = vld [vmem:[%s2642_s1 + $0x70] sm:$0xff]  }
   0x7   :  { %1983 = vmatprep.subr.bf16.mxu0 %v2272_v1 }
   0x8   :  { %1978 = vmatpush3.bf16.msra.mxu1 %v2192_v7 }
   0x9   :  { %1972 = vmatmul.mubr.msk.bf16.vlgmr.msra.gmra.mrb[0].mxu0 %vm82_vm1, %v2324_v6  ;;  %1991 = vmatprep.subr.bf16.mxu1 %v2272_v1 }
   0xa   :  { %1984 = vmatpush3.bf16.msra.mxu0 %v2191_v8  ;;  %1987 = vmatprep.mubr.msk.bf16.mxu0 %vm2273_vm0, %v2272_v1 }
   0xb   :  { %1985 = vmatprep.subr.bf16.mxu0 %v2272_v1  ;;  %1980 = vmatmul.mubr.msk.bf16.vlgmr.msra.gmra.mrb[0].mxu1 %vm82_vm1, %v2324_v6 }
   0xc   :  { %1992 = vmatpush3.bf16.msra.mxu1 %v2194_v9  ;;  %1995 = vmatprep.mubr.msk.bf16.mxu1 %vm2273_vm0, %v2272_v1 }
   0xd   :  { %1993 = vmatprep.subr.bf16.mxu1 %v2272_v1 }
   0xe   :  { %1986 = vmatpush3.bf16.msra.mxu0 %v2193_v10 }
   0xf   :  { %1999 = vmatprep.subr.bf16.mxu0 %v2272_v1 }
  0x10   :  { %1994 = vmatpush3.bf16.msra.mxu1 %v2196_v11 }
  0x11   :  { %1988 = vmatmul.mubr.msk.bf16.vlgmr.msra.gmra.mrb[4].mxu0 %vm82_vm1, %v2324_v6  ;;  %2007 = vmatprep.subr.bf16.mxu1 %v2272_v1 }
  0x12   :  { %2000 = vmatpush3.bf16.msra.mxu0 %v2195_v12  ;;  %2003 = vmatprep.mubr.msk.bf16.mxu0 %vm2273_vm0, %v2272_v1 }
  0x13   :  { %2001 = vmatprep.subr.bf16.mxu0 %v2272_v1  ;;  %1996 = vmatmul.mubr.msk.bf16.vlgmr.msra.gmra.mrb[4].mxu1 %vm82_vm1, %v2324_v6 }
  0x14   :  { %2008 = vmatpush3.bf16.msra.mxu1 %v2198_v13  ;;  %2011 = vmatprep.mubr.msk.bf16.mxu1 %vm2273_vm0, %v2272_v1 }
  0x15   :  { %2009 = vmatprep.subr.bf16.mxu1 %v2272_v1 }
  0x16   :  { %2002 = vmatpush3.bf16.msra.mxu0 %v2197_v14 }
  0x17   :  { %2015 = vmatprep.subr.bf16.mxu0 %v2272_v1 }
  0x18   :  { %2010 = vmatpush3.bf16.msra.mxu1 %v2199_v15 }
  0x19   :  { %2004 = vmatmul.mubr.msk.bf16.vlgmr.msra.gmra.mrb[8].mxu0 %vm82_vm1, %v2324_v6  ;;  %2023 = vmatprep.subr.bf16.mxu1 %v2272_v1 }
  0x1a   :  { %9 = vsyncpa [#allocation3], 0  ;;  %2016 = vmatpush3.bf16.msra.mxu0 %v2200_v16  ;;  %v2201_v18 = vld [vmem:[%s2642_s1 + $0x68] sm:$0xff]   ;;  %2019 = vmatprep.mubr.msk.bf16.mxu0 %vm2273_vm0, %v2272_v1  ;;  %v2203_v19 = vld [vmem:[%s2642_s1 + $0x78] sm:$0xff]   ;;  %vm734_vm2 = vcmask 130048   ;;  %vm1211_vm3 = vcmask 1043456  }
  0x1b   :  { %2012 = vmatmul.mubr.msk.bf16.vlgmr.msra.gmra.mrb[8].mxu1 %vm82_vm1, %v2324_v6  ;;  %2017 = vmatprep.subr.bf16.mxu0 %v2272_v1  ;;  %v2204_v20 = vld [vmem:[%s2642_s1 + $0x80] sm:$0xff]   ;;  %v2205_v21 = vld [vmem:[%s2642_s1 + $0x88] sm:$0xff]   ;;  %v2206_v22 = vld [vmem:[%s2642_s1 + $0x90] sm:$0xff]   ;;  %vm1103_vm4 = vcmask 64512   ;;  %s2274_s21 = smov [#allocation2]  }
  0x1c   :  { %2024 = vmatpush3.bf16.msra.mxu1 %v2202_v17  ;;  %2027 = vmatprep.mubr.msk.bf16.mxu1 %vm2273_vm0, %v2272_v1  ;;  %v2207_v23 = vld [vmem:[%s2642_s1 + $0x98] sm:$0xff]   ;;  %v2208_v24 = vld [vmem:[%s2642_s1 + $0xa0] sm:$0xff]   ;;  %v2209_v25 = vld [vmem:[%s2642_s1 + $0xb0] sm:$0xff]   ;;  %s1819_s22 = sshll.u32 %s2274_s21, 4  ;;  %s1820_s22 = int_to_ptr.vmem [resolvable:$true] %s1819_s22 }
  0x1d   :  { %2025 = vmatprep.subr.bf16.mxu1 %v2272_v1  ;;  %v2210_v26 = vld [vmem:[%s2642_s1 + $0xa8] sm:$0xff]   ;;  %v2211_v27 = vld [vmem:[%s2642_s1 + $0xb8] sm:$0xff]   ;;  %s2248_s23 = scalar_lea.vmem %s1820_s22, 256  ;;  %p2253_p1 = scmp.lt.s32.totalorder %s1820_s22, %s1820_s22 }
  0x1e   :  { %2018 = vmatpush3.bf16.msra.mxu0 %v2201_v18  ;;  %p2249_p0 = scmp.ne.s32.totalorder %s1820_s22, %s2248_s23  ;;  %p2254_p2 = scmp.lt.s32.totalorder %s2248_s23, %s2248_s23 }
  0x1f   :  { %2031 = vmatprep.subr.bf16.mxu0 %v2272_v1 }
  0x20   :  { %2026 = vmatpush3.bf16.msra.mxu1 %v2203_v19  ;;  %p2255_p3 = por %p2254_p2, %p2253_p1 }
  0x21   :  { %2020 = vmatmul.mubr.msk.bf16.vlgmr.msra.gmra.mrb[12].mxu0 %vm82_vm1, %v2324_v6  ;;  %2039 = vmatprep.subr.bf16.mxu1 %v2272_v1 }
  0x22   :  { %2032 = vmatpush3.bf16.msra.mxu0 %v2204_v20  ;;  %2035 = vmatprep.mubr.msk.bf16.mxu0 %vm2273_vm0, %v2272_v1  ;;  %p2256_p4 = pnand %p2255_p3, %p2249_p0 }
  0x23   :  { %2028 = vmatmul.mubr.msk.bf16.vlgmr.msra.gmra.mrb[12].mxu1 %vm82_vm1, %v2324_v6  ;;  %2033 = vmatprep.subr.bf16.mxu0 %v2272_v1 }
  0x24   :  { %2043 = vmatprep.mubr.msk.bf16.mxu1 %vm2273_vm0, %v2272_v1  ;;  %2040 = vmatpush3.bf16.msra.mxu1 %v2206_v22 }
  0x25   :  { %2041 = vmatprep.subr.bf16.mxu1 %v2272_v1 }
  0x26   :  { %2034 = vmatpush3.bf16.msra.mxu0 %v2205_v21 }
  0x27   :  { %2047 = vmatprep.subr.bf16.mxu0 %v2272_v1 }
  0x28   :  { %2042 = vmatpush3.bf16.msra.mxu1 %v2207_v23 }
  0x29   :  { %2036 = vmatmul.mubr.msk.bf16.vlgmr.msra.gmra.mrb[16].mxu0 %vm82_vm1, %v2324_v6  ;;  %2055 = vmatprep.subr.bf16.mxu1 %v2272_v1 }
  0x2a   :  { %2051 = vmatprep.mubr.msk.bf16.mxu0 %vm2273_vm0, %v2272_v1  ;;  %2048 = vmatpush3.bf16.msra.mxu0 %v2208_v24 }
  0x2b   :  { %2044 = vmatmul.mubr.msk.bf16.vlgmr.msra.gmra.mrb[16].mxu1 %vm82_vm1, %v2324_v6  ;;  %2049 = vmatprep.subr.bf16.mxu0 %v2272_v1 }
  0x2c   :  { %2056 = vmatpush3.bf16.msra.mxu1 %v2209_v25  ;;  %2059 = vmatprep.mubr.msk.bf16.mxu1 %vm2273_vm0, %v2272_v1 }
  0x2d   :  { %2057 = vmatprep.subr.bf16.mxu1 %v2272_v1 }
  0x2e   :  { %2050 = vmatpush3.bf16.msra.mxu0 %v2210_v26 }
  0x2f   :  { %2063 = vmatprep.subr.bf16.mxu0 %v2272_v1 }
  0x30   :  { %2058 = vmatpush3.bf16.msra.mxu1 %v2211_v27 }
  0x31   :  { %2052 = vmatmul.mubr.msk.bf16.vlgmr.msra.gmra.mrb[20].mxu0 %vm82_vm1, %v2324_v6  ;;  %2069 = vmatprep.subr.bf16.mxu1 %v2272_v1 }
  0x32   :  { %2065 = vmatprep.mubr.msk.bf16.mxu0 %vm2273_vm0, %v2272_v1 }
  0x33   :  { %2060 = vmatmul.mubr.msk.bf16.vlgmr.msra.gmra.mrb[20].mxu1 %vm82_vm1, %v2324_v6 }
  0x34   :  { %2071 = vmatprep.mubr.msk.bf16.mxu1 %vm2273_vm0, %v2272_v1 }
  0xdc   :  { %v120_v28 = vpop.f32.mrb[0].mxu0 }
  0xdd   :  { %v1973_v29 = vpop.f32.mrb[1].mxu0  ;;  %v710_v58 = vpack.c.bf16 %v120_v28, %v120_v28 }
  0xde   :  { %v123_v30 = vpop.f32.mrb[2].mxu0  ;;  %v173_v31 = vpop.f32.mrb[0].mxu1 }
  0xdf   :  { %v1974_v32 = vpop.f32.mrb[3].mxu0  ;;  %v1981_v33 = vpop.f32.mrb[1].mxu1  ;;  %v711_v0 = vpack.c.bf16 %v123_v30, %v123_v30  ;;  %v712_v9 = vpack.c.bf16 %v173_v31, %v173_v31 }
  0xe0   :  { %v176_v34 = vpop.f32.mrb[2].mxu1 }
  0xe1   :  { %v1982_v35 = vpop.f32.mrb[3].mxu1  ;;  %v713_v11 = vpack.c.bf16 %v176_v34, %v176_v34 }
  0xe4   :  { %v2460_v36 = vpop.f32.mrb[4].mxu0 }
  0xe5   :  { %v1989_v37 = vpop.f32.mrb[5].mxu0  ;;  %v714_v15 = vpack.c.bf16 %v2460_v36, %v2460_v36 }
  0xe6   :  { %v2462_v38 = vpop.f32.mrb[6].mxu0  ;;  %v2464_v39 = vpop.f32.mrb[4].mxu1 }
  0xe7   :  { %v1990_v40 = vpop.f32.mrb[7].mxu0  ;;  %v1997_v41 = vpop.f32.mrb[5].mxu1  ;;  %v715_v17 = vpack.c.bf16 %v2462_v38, %v2462_v38  ;;  %v716_v19 = vpack.c.bf16 %v2464_v39, %v2464_v39 }
  0xe8   :  { %v2466_v42 = vpop.f32.mrb[6].mxu1 }
  0xe9   :  { %v1998_v43 = vpop.f32.mrb[7].mxu1  ;;  %v717_v20 = vpack.c.bf16 %v2466_v42, %v2466_v42 }
  0xec   :  { %v332_v44 = vpop.f32.mrb[8].mxu0 }
  0xed   :  { %v718_v45 = vpack.c.bf16 %v332_v44, %v332_v44  ;;  %v2005_v46 = vpop.f32.mrb[9].mxu0 }
  0xee   :  { %v335_v47 = vpop.f32.mrb[10].mxu0  ;;  %v385_v48 = vpop.f32.mrb[8].mxu1 }
  0xef   :  { %v739_v49 = vsel %vm734_vm2, %v718_v45, 0  ;;  %v719_v50 = vpack.c.bf16 %v335_v47, %v335_v47  ;;  %v2006_v51 = vpop.f32.mrb[11].mxu0  ;;  %v2013_v52 = vpop.f32.mrb[9].mxu1  ;;  %v720_v55 = vpack.c.bf16 %v385_v48, %v385_v48 }
  0xf0   :  { %2064 = vmatpush3.bf16.xpose.msra.mxu0 %v739_v49  ;;  %v388_v53 = vpop.f32.mrb[10].mxu1 }
  0xf1   :  { %v785_v54 = vsel %vm734_vm2, %v719_v50, 0  ;;  %v2014_v56 = vpop.f32.mrb[11].mxu1  ;;  %2075 = vmatprep.subr.bf16.mxu0 %v2272_v1  ;;  %v831_v59 = vsel %vm734_vm2, %v720_v55, 0  ;;  %v721_v60 = vpack.c.bf16 %v388_v53, %v388_v53 }
  0xf2   :  { %2070 = vmatpush3.bf16.xpose.msra.mxu1 %v785_v54 }
  0xf3   :  { %2081 = vmatprep.subr.bf16.mxu1 %v2272_v1  ;;  %v877_v5 = vsel %vm734_vm2, %v721_v60, 0 }
  0xf4   :  { %v438_v57 = vpop.f32.mrb[12].mxu0 }
  0xf5   :  { %v2021_v61 = vpop.f32.mrb[13].mxu0  ;;  %v722_v6 = vpack.c.bf16 %v438_v57, %v438_v57 }
  0xf6   :  { %v441_v62 = vpop.f32.mrb[14].mxu0  ;;  %v491_v63 = vpop.f32.mrb[12].mxu1 }
  0xf7   :  { %2066 = vmatmul.mubr.msk.bf16.vlgmr.msra.gmra.mrb[24].mxu0 %vm734_vm2, %v710_v58  ;;  %v2022_v2 = vpop.f32.mrb[15].mxu0  ;;  %v2029_v3 = vpop.f32.mrb[13].mxu1  ;;  %v723_v8 = vpack.c.bf16 %v441_v62, %v441_v62  ;;  %v923_v10 = vsel %vm734_vm2, %v722_v6, 0  ;;  %v724_v13 = vpack.c.bf16 %v491_v63, %v491_v63 }
  0xf8   :  { %2076 = vmatpush3.bf16.xpose.msra.mxu0 %v831_v59  ;;  %2077 = vmatprep.mubr.msk.bf16.mxu0 %vm2273_vm0, %v2272_v1  ;;  %v494_v4 = vpop.f32.mrb[14].mxu1 }
  0xf9   :  { %2072 = vmatmul.mubr.msk.bf16.vlgmr.msra.gmra.mrb[24].mxu1 %vm734_vm2, %v711_v0  ;;  %2087 = vmatprep.subr.bf16.mxu0 %v2272_v1  ;;  %v2030_v7 = vpop.f32.mrb[15].mxu1  ;;  %v969_v12 = vsel %vm734_vm2, %v723_v8, 0  ;;  %v725_v14 = vpack.c.bf16 %v494_v4, %v494_v4  ;;  %v1015_v16 = vsel %vm734_vm2, %v724_v13, 0 }
  0xfa   :  { %2082 = vmatpush3.bf16.xpose.msra.mxu1 %v877_v5  ;;  %2083 = vmatprep.mubr.msk.bf16.mxu1 %vm2273_vm0, %v2272_v1 }
  0xfb   :  { %2093 = vmatprep.subr.bf16.mxu1 %v2272_v1  ;;  %v1061_v18 = vsel %vm734_vm2, %v725_v14, 0 }
  0xfc   :  { %v544_v21 = vpop.f32.mrb[16].mxu0 }
  0xfd   :  { %v726_v22 = vpack.c.bf16 %v544_v21, %v544_v21  ;;  %v2037_v23 = vpop.f32.mrb[17].mxu0 }
  0xfe   :  { %v547_v24 = vpop.f32.mrb[18].mxu0  ;;  %v597_v28 = vpop.f32.mrb[16].mxu1 }
  0xff   :  { %2078 = vmatmul.mubr.msk.bf16.vlgmr.msra.gmra.mrb[28].mxu0 %vm734_vm2, %v712_v9  ;;  %v1213_v25 = vsel %vm1211_vm3, %v726_v22, 0  ;;  %v727_v26 = vpack.c.bf16 %v547_v24, %v547_v24  ;;  %v2038_v27 = vpop.f32.mrb[19].mxu0  ;;  %v728_v30 = vpack.c.bf16 %v597_v28, %v597_v28  ;;  %v2045_v31 = vpop.f32.mrb[17].mxu1 }
 0x100   :  { %2088 = vmatpush3.bf16.xpose.msra.mxu0 %v923_v10  ;;  %2089 = vmatprep.mubr.msk.bf16.mxu0 %vm2273_vm0, %v2272_v1  ;;  %v600_v32 = vpop.f32.mrb[18].mxu1 }
 0x101   :  { %2084 = vmatmul.mubr.msk.bf16.vlgmr.msra.gmra.mrb[28].mxu1 %vm734_vm2, %v713_v11  ;;  %2099 = vmatprep.subr.bf16.mxu0 %v2272_v1  ;;  %v1259_v29 = vsel %vm1211_vm3, %v727_v26, 0  ;;  %v2520_v33 = vsel %vm1211_vm3, %v728_v30, 0  ;;  %v729_v34 = vpack.c.bf16 %v600_v32, %v600_v32  ;;  %v2046_v35 = vpop.f32.mrb[19].mxu1 }
 0x102   :  { %2094 = vmatpush3.bf16.xpose.msra.mxu1 %v969_v12  ;;  %2095 = vmatprep.mubr.msk.bf16.mxu1 %vm2273_vm0, %v2272_v1 }
 0x103   :  { %2105 = vmatprep.subr.bf16.mxu1 %v2272_v1  ;;  %v2524_v36 = vsel %vm1211_vm3, %v729_v34, 0 }
 0x104   :  { %v650_v37 = vpop.f32.mrb[20].mxu0 }
 0x105   :  { %v730_v38 = vpack.c.bf16 %v650_v37, %v650_v37  ;;  %v2053_v39 = vpop.f32.mrb[21].mxu0 }
 0x106   :  { %v653_v40 = vpop.f32.mrb[22].mxu0  ;;  %v703_v41 = vpop.f32.mrb[20].mxu1 }
 0x107   :  { %2090 = vmatmul.mubr.msk.bf16.vlgmr.msra.gmra.mrb[32].mxu0 %vm734_vm2, %v714_v15  ;;  %v2527_v42 = vsel %vm1211_vm3, %v730_v38, 0  ;;  %v731_v43 = vpack.c.bf16 %v653_v40, %v653_v40  ;;  %v2054_v44 = vpop.f32.mrb[23].mxu0  ;;  %v732_v45 = vpack.c.bf16 %v703_v41, %v703_v41  ;;  %v2061_v46 = vpop.f32.mrb[21].mxu1 }
 0x108   :  { %2100 = vmatpush3.bf16.xpose.msra.mxu0 %v1015_v16  ;;  %2101 = vmatprep.mubr.msk.bf16.mxu0 %vm2273_vm0, %v2272_v1  ;;  %v706_v47 = vpop.f32.mrb[22].mxu1 }
 0x109   :  { %2096 = vmatmul.mubr.msk.bf16.vlgmr.msra.gmra.mrb[32].mxu1 %vm734_vm2, %v715_v17  ;;  %2111 = vmatprep.subr.bf16.mxu0 %v2272_v1  ;;  %v2530_v48 = vsel %vm1211_vm3, %v731_v43, 0  ;;  %v2533_v49 = vsel %vm1211_vm3, %v732_v45, 0  ;;  %v733_v50 = vpack.c.bf16 %v706_v47, %v706_v47  ;;  %v2062_v51 = vpop.f32.mrb[23].mxu1 }
 0x10a   :  { %2106 = vmatpush3.bf16.xpose.msra.mxu1 %v1061_v18  ;;  %2107 = vmatprep.mubr.msk.bf16.mxu1 %vm2273_vm0, %v2272_v1 }
 0x10b   :  { %2117 = vmatprep.subr.bf16.mxu1 %v2272_v1  ;;  %v2536_v52 = vsel %vm1211_vm3, %v733_v50, 0 }
 0x10f   :  { %2102 = vmatmul.mubr.msk.bf16.vlgmr.msra.gmra.mrb[36].mxu0 %vm734_vm2, %v716_v19 }
 0x110   :  { %2113 = vmatprep.mubr.msk.bf16.mxu0 %vm2273_vm0, %v2272_v1  ;;  %2112 = vmatpush3.bf16.msra.mxu0 %v1213_v25 }
 0x111   :  { %2108 = vmatmul.mubr.msk.bf16.vlgmr.msra.gmra.mrb[36].mxu1 %vm734_vm2, %v717_v20  ;;  %2123 = vmatprep.subr.bf16.mxu0 %v2272_v1 }
 0x112   :  { %2119 = vmatprep.mubr.msk.bf16.mxu1 %vm2273_vm0, %v2272_v1  ;;  %2118 = vmatpush3.bf16.msra.mxu1 %v1259_v29 }
 0x113   :  { %2129 = vmatprep.subr.bf16.mxu1 %v2272_v1 }
 0x1ca   :  { %v775_v53 = vpop.f32.mrb[24].mxu0 }
 0x1cb   :  { %v2067_v54 = vpop.f32.mrb[25].mxu0  ;;  %v1104_v55 = vsel %vm1103_vm4, %v775_v53, -inf }
 0x1cc   :  { %v821_v56 = vpop.f32.mrb[24].mxu1  ;;  %1105 = vmax.xlane.f32.xlu0 %v1104_v55  ;;  %v778_v57 = vpop.f32.mrb[26].mxu0 }
 0x1cd   :  { %v2068_v58 = vpop.f32.mrb[27].mxu0  ;;  %v2073_v59 = vpop.f32.mrb[25].mxu1  ;;  %v1107_v62 = vsel %vm1103_vm4, %v821_v56, -inf }
 0x1ce   :  { %v824_v60 = vpop.f32.mrb[26].mxu1 }
 0x1cf   :  { %v2074_v61 = vpop.f32.mrb[27].mxu1 }
 0x1d0   :  { %1108 = vmax.xlane.f32.xlu0 %v1107_v62 }
 0x1d2   :  { %v867_v63 = vpop.f32.mrb[28].mxu0 }
 0x1d3   :  { %v2079_v0 = vpop.f32.mrb[29].mxu0  ;;  %v1110_v2 = vsel %vm1103_vm4, %v867_v63, -inf }
 0x1d4   :  { %v913_v3 = vpop.f32.mrb[28].mxu1  ;;  %1111 = vmax.xlane.f32.xlu1 %v1110_v2  ;;  %v870_v4 = vpop.f32.mrb[30].mxu0 }
 0x1d5   :  { %v2080_v5 = vpop.f32.mrb[31].mxu0  ;;  %v2085_v6 = vpop.f32.mrb[29].mxu1  ;;  %v1113_v9 = vsel %vm1103_vm4, %v913_v3, -inf }
 0x1d6   :  { %v916_v7 = vpop.f32.mrb[30].mxu1 }
 0x1d7   :  { %v2086_v8 = vpop.f32.mrb[31].mxu1 }
 0x1d8   :  { %1114 = vmax.xlane.f32.xlu1 %v1113_v9 }
 0x1da   :  { %v959_v10 = vpop.f32.mrb[32].mxu0 }
 0x1db   :  { %v2091_v11 = vpop.f32.mrb[33].mxu0  ;;  %v1116_v12 = vsel %vm1103_vm4, %v959_v10, -inf }
 0x1dc   :  { %v1005_v13 = vpop.f32.mrb[32].mxu1  ;;  %1117 = vmax.xlane.f32.xlu0 %v1116_v12  ;;  %v962_v14 = vpop.f32.mrb[34].mxu0 }
 0x1dd   :  { %v2092_v15 = vpop.f32.mrb[35].mxu0  ;;  %v2097_v16 = vpop.f32.mrb[33].mxu1  ;;  %v1119_v17 = vsel %vm1103_vm4, %v1005_v13, -inf }
 0x1de   :  { %v1008_v18 = vpop.f32.mrb[34].mxu1  ;;  %1120 = vmax.xlane.f32.xlu1 %v1119_v17 }
 0x1df   :  { %v2098_v19 = vpop.f32.mrb[35].mxu1 }
 0x1e2   :  { %v1051_v20 = vpop.f32.mrb[36].mxu0 }
 0x1e3   :  { %v2103_v21 = vpop.f32.mrb[37].mxu0  ;;  %v1122_v22 = vsel %vm1103_vm4, %v1051_v20, -inf }
 0x1e4   :  { %v1097_v23 = vpop.f32.mrb[36].mxu1  ;;  %1123 = vmax.xlane.f32.xlu0 %v1122_v22  ;;  %v1054_v24 = vpop.f32.mrb[38].mxu0 }
 0x1e5   :  { %v2104_v25 = vpop.f32.mrb[39].mxu0  ;;  %v2109_v26 = vpop.f32.mrb[37].mxu1  ;;  %v1125_v27 = vsel %vm1103_vm4, %v1097_v23, -inf }
 0x1e6   :  { %v1100_v28 = vpop.f32.mrb[38].mxu1  ;;  %1126 = vmax.xlane.f32.xlu1 %v1125_v27 }
 0x1e7   :  { %v2110_v29 = vpop.f32.mrb[39].mxu1 }
 0x259   :  { %v1106_v30 = vpop.xlane.xlu0 %1105 }
 0x25a   :  { %v1128_v31 = vsub.f32 %v775_v53, %v1106_v30 }
 0x25c   :  { %v1136_v32 = vmul.f32 1.442695, %v1128_v31 }
 0x25d   :  { %v1109_v34 = vpop.xlane.xlu0 %1108 }
 0x25e   :  { %2216 = vpow2.f32 %v1136_v32  ;;  %v1129_v35 = vsub.f32 %v821_v56, %v1109_v34 }
 0x260   :  { %v1138_v37 = vmul.f32 1.442695, %v1129_v35 }
 0x261   :  { %v1112_v38 = vpop.xlane.xlu1 %1111 }
 0x262   :  { %2218 = vpow2.f32 %v1138_v37  ;;  %v1130_v39 = vsub.f32 %v867_v63, %v1112_v38 }
 0x264   :  { %v1140_v40 = vmul.f32 1.442695, %v1130_v39 }
 0x265   :  { %v1115_v41 = vpop.xlane.xlu1 %1114 }
 0x266   :  { %2220 = vpow2.f32 %v1140_v40  ;;  %v1131_v43 = vsub.f32 %v913_v3, %v1115_v41 }
 0x268   :  { %v2217_v44 = vpop.eup %2216  ;;  %v1142_v45 = vmul.f32 1.442695, %v1131_v43  ;;  %v2213_v43 = vld [vmem:[%s2643_s2 + $0x8] sm:$0xff]  }
 0x269   :  { %v1118_v46 = vpop.xlane.xlu0 %1117  ;;  %v1152_v47 = vsel %vm1103_vm4, %v2217_v44, 0.0 }
 0x26a   :  { %2222 = vpow2.f32 %v1142_v45  ;;  %v1132_v50 = vsub.f32 %v959_v10, %v1118_v46  ;;  %1153 = vadd.xlane.f32.xlu0 %v1152_v47 }
 0x26b   :  { %v1121_v51 = vpop.xlane.xlu1 %1120 }
 0x26c   :  { %v2219_v53 = vpop.eup %2218  ;;  %v1144_v54 = vmul.f32 1.442695, %v1132_v50  ;;  %v1133_v55 = vsub.f32 %v1005_v13, %v1121_v51  ;;  %v2214_v51 = vld [vmem:[%s2643_s2 + $0x10] sm:$0xff]  }
 0x26d   :  { %v1155_v56 = vsel %vm1103_vm4, %v2219_v53, 0.0 }
 0x26e   :  { %2224 = vpow2.f32 %v1144_v54  ;;  %v1146_v57 = vmul.f32 1.442695, %v1133_v55  ;;  %1156 = vadd.xlane.f32.xlu1 %v1155_v56 }
 0x270   :  { %v2221_v58 = vpop.eup %2220  ;;  %2226 = vpow2.f32 %v1146_v57 }
 0x271   :  { %v1124_v59 = vpop.xlane.xlu0 %1123  ;;  %v1158_v60 = vsel %vm1103_vm4, %v2221_v58, 0.0 }
 0x272   :  { %v1134_v61 = vsub.f32 %v1051_v20, %v1124_v59  ;;  %1159 = vadd.xlane.f32.xlu0 %v1158_v60 }
 0x273   :  { %v1127_v62 = vpop.xlane.xlu1 %1126 }
 0x274   :  { %v2223_v63 = vpop.eup %2222  ;;  %v1148_v0 = vmul.f32 1.442695, %v1134_v61  ;;  %v1135_v2 = vsub.f32 %v1097_v23, %v1127_v62  ;;  %v2215_v62 = vld [vmem:[%s2643_s2 + $0x18] sm:$0xff]  }
 0x275   :  { %v1161_v3 = vsel %vm1103_vm4, %v2223_v63, 0.0 }
 0x276   :  { %2228 = vpow2.f32 %v1148_v0  ;;  %v1150_v4 = vmul.f32 1.442695, %v1135_v2  ;;  %1162 = vadd.xlane.f32.xlu1 %v1161_v3 }
 0x278   :  { %v2225_v5 = vpop.eup %2224  ;;  %2230 = vpow2.f32 %v1150_v4 }
 0x279   :  { %v1164_v6 = vsel %vm1103_vm4, %v2225_v5, 0.0 }
 0x27a   :  { %v2227_v7 = vpop.eup %2226  ;;  %1165 = vadd.xlane.f32.xlu0 %v1164_v6 }
 0x27b   :  { %v1167_v8 = vsel %vm1103_vm4, %v2227_v7, 0.0 }
 0x27c   :  { %1168 = vadd.xlane.f32.xlu1 %v1167_v8 }
 0x280   :  { %v2229_v9 = vpop.eup %2228 }
 0x281   :  { %v1170_v10 = vsel %vm1103_vm4, %v2229_v9, 0.0 }
 0x282   :  { %v2553_v11 = vpop.eup %2230  ;;  %1171 = vadd.xlane.f32.xlu0 %v1170_v10 }
 0x283   :  { %v1173_v12 = vsel %vm1103_vm4, %v2553_v11, 0.0 }
 0x284   :  { %1174 = vadd.xlane.f32.xlu1 %v1173_v12 }
 0x2f7   :  { %v1154_v13 = vpop.xlane.xlu0 %1153 }
 0x2f8   :  { %2232 = vrcp.f32 %v1154_v13 }
 0x2fb   :  { %v1157_v14 = vpop.xlane.xlu1 %1156 }
 0x2fc   :  { %2234 = vrcp.f32 %v1157_v14 }
 0x2ff   :  { %v1160_v15 = vpop.xlane.xlu0 %1159 }
 0x300   :  { %2236 = vrcp.f32 %v1160_v15 }
 0x302   :  { %v2233_v16 = vpop.eup %2232 }
 0x303   :  { %v1192_v17 = vmul.f32 %v2233_v16, %v2217_v44  ;;  %v1163_v18 = vpop.xlane.xlu1 %1162 }
 0x304   :  { %2238 = vrcp.f32 %v1163_v18 }
 0x305   :  { %v1200_v19 = vpack.c.bf16 %v1192_v17, %v1192_v17 }
 0x306   :  { %v2235_v20 = vpop.eup %2234 }
 0x307   :  { %v1193_v21 = vmul.f32 %v2235_v20, %v2219_v53  ;;  %2114 = vmatmul.mubr.msk.bf16.vlgmr.msra.gmra.mrb[40].mxu0 %vm1103_vm4, %v1200_v19  ;;  %v1166_v22 = vpop.xlane.xlu0 %1165 }
 0x308   :  { %2124 = vmatpush3.bf16.msra.mxu0 %v2520_v33  ;;  %2240 = vrcp.f32 %v1166_v22  ;;  %2125 = vmatprep.mubr.msk.bf16.mxu0 %vm2273_vm0, %v2272_v1 }
 0x309   :  { %v1169_v23 = vpop.xlane.xlu1 %1168  ;;  %v1201_v24 = vpack.c.bf16 %v1193_v21, %v1193_v21  ;;  %2135 = vmatprep.subr.bf16.mxu0 %v2272_v1 }
 0x30a   :  { %v2237_v25 = vpop.eup %2236  ;;  %2242 = vrcp.f32 %v1169_v23 }
 0x30b   :  { %v1194_v26 = vmul.f32 %v2237_v25, %v2221_v58  ;;  %2120 = vmatmul.mubr.msk.bf16.vlgmr.msra.gmra.mrb[40].mxu1 %vm1103_vm4, %v1201_v24 }
 0x30c   :  { %2130 = vmatpush3.bf16.msra.mxu1 %v2524_v36  ;;  %2131 = vmatprep.mubr.msk.bf16.mxu1 %vm2273_vm0, %v2272_v1 }
 0x30d   :  { %v1202_v27 = vpack.c.bf16 %v1194_v26, %v1194_v26  ;;  %2141 = vmatprep.subr.bf16.mxu1 %v2272_v1 }
 0x30e   :  { %v2239_v33 = vpop.eup %2238 }
 0x30f   :  { %v1195_v28 = vmul.f32 %v2239_v33, %v2223_v63  ;;  %2126 = vmatmul.mubr.msk.bf16.vlgmr.msra.gmra.mrb[44].mxu0 %vm1103_vm4, %v1202_v27  ;;  %v1172_v29 = vpop.xlane.xlu0 %1171 }
 0x310   :  { %2136 = vmatpush3.bf16.msra.mxu0 %v2527_v42  ;;  %2244 = vrcp.f32 %v1172_v29  ;;  %2137 = vmatprep.mubr.msk.bf16.mxu0 %vm2273_vm0, %v2272_v1 }
 0x311   :  { %v1175_v30 = vpop.xlane.xlu1 %1174  ;;  %v1203_v31 = vpack.c.bf16 %v1195_v28, %v1195_v28  ;;  %2147 = vmatprep.subr.bf16.mxu0 %v2272_v1 }
 0x312   :  { %v2241_v36 = vpop.eup %2240  ;;  %2246 = vrcp.f32 %v1175_v30 }
 0x313   :  { %v1196_v32 = vmul.f32 %v2241_v36, %v2225_v5  ;;  %2132 = vmatmul.mubr.msk.bf16.vlgmr.msra.gmra.mrb[44].mxu1 %vm1103_vm4, %v1203_v31 }
 0x314   :  { %v2243_v34 = vpop.eup %2242  ;;  %2142 = vmatpush3.bf16.msra.mxu1 %v2530_v48  ;;  %2143 = vmatprep.mubr.msk.bf16.mxu1 %vm2273_vm0, %v2272_v1 }
 0x315   :  { %v1197_v42 = vmul.f32 %v2243_v34, %v2227_v7  ;;  %v1204_v35 = vpack.c.bf16 %v1196_v32, %v1196_v32  ;;  %2153 = vmatprep.subr.bf16.mxu1 %v2272_v1 }
 0x317   :  { %2138 = vmatmul.mubr.msk.bf16.vlgmr.msra.gmra.mrb[48].mxu0 %vm1103_vm4, %v1204_v35  ;;  %v1205_v37 = vpack.c.bf16 %v1197_v42, %v1197_v42 }
 0x318   :  { %2148 = vmatpush3.bf16.msra.mxu0 %v2533_v49  ;;  %2149 = vmatprep.mubr.msk.bf16.mxu0 %vm2273_vm0, %v2272_v1 }
 0x319   :  { %2159 = vmatprep.subr.bf16.mxu0 %v2272_v1 }
 0x31a   :  { %v2245_v38 = vpop.eup %2244 }
 0x31b   :  { %v1198_v39 = vmul.f32 %v2245_v38, %v2229_v9  ;;  %2144 = vmatmul.mubr.msk.bf16.vlgmr.msra.gmra.mrb[48].mxu1 %vm1103_vm4, %v1205_v37 }
 0x31c   :  { %v2247_v48 = vpop.eup %2246  ;;  %2154 = vmatpush3.bf16.msra.mxu1 %v2536_v52  ;;  %2155 = vmatprep.mubr.msk.bf16.mxu1 %vm2273_vm0, %v2272_v1  ;;  %v2212_v52 = vld [vmem:[%s2643_s2] sm:$0xff]  }
 0x31d   :  { %v1206_v40 = vpack.c.bf16 %v1198_v39, %v1198_v39  ;;  %v1199_v41 = vmul.f32 %v2247_v48, %v2553_v11  ;;  %2165 = vmatprep.subr.bf16.mxu1 %v2272_v1 }
 0x31f   :  { %2150 = vmatmul.mubr.msk.bf16.vlgmr.msra.gmra.mrb[52].mxu0 %vm1103_vm4, %v1206_v40  ;;  %v1207_v49 = vpack.c.bf16 %v1199_v41, %v1199_v41 }
 0x320   :  { %2161 = vmatprep.mubr.msk.bf16.mxu0 %vm2273_vm0, %v2272_v1  ;;  %2160 = vmatpush3.bf16.msra.mxu0 %v2212_v52  ;;  %v1890_v52 = vld [vmem:[%s2644_s3] ss:$0 sm:$0xff] }
 0x321   :  { %2171 = vmatprep.subr.bf16.mxu0 %v2272_v1 }
 0x323   :  { %2156 = vmatmul.mubr.msk.bf16.vlgmr.msra.gmra.mrb[52].mxu1 %vm1103_vm4, %v1207_v49 }
 0x324   :  { %2167 = vmatprep.mubr.msk.bf16.mxu1 %vm2273_vm0, %v2272_v1  ;;  %2166 = vmatpush3.bf16.msra.mxu1 %v2213_v43 }
 0x325   :  { %2177 = vmatprep.subr.bf16.mxu1 %v2272_v1 }
 0x3da   :  { %v1249_v44 = vpop.f32.mrb[40].mxu0 }
 0x3db   :  { %v2115_v45 = vpop.f32.mrb[41].mxu0 }
 0x3dc   :  { %v1252_v46 = vpop.f32.mrb[42].mxu0 }
 0x3dd   :  { %v2116_v47 = vpop.f32.mrb[43].mxu0 }
 0x3de   :  { %v1295_v50 = vpop.f32.mrb[40].mxu1 }
 0x3df   :  { %v1577_v53 = vpack.c.bf16 %v1295_v50, %v1249_v44  ;;  %v2121_v54 = vpop.f32.mrb[41].mxu1 }
 0x3e0   :  { %v1298_v55 = vpop.f32.mrb[42].mxu1 }
 0x3e1   :  { %v2122_v56 = vpop.f32.mrb[43].mxu1  ;;  %2162 = vmatmul.mubr.msk.bf16.vlgmr.msra.gmra.mrb[56].mxu0 %vm734_vm2, %v1577_v53 }
 0x3e2   :  { %v1341_v57 = vpop.f32.mrb[44].mxu0  ;;  %2172 = vmatpush3.bf16.msra.mxu0 %v2214_v51  ;;  %2173 = vmatprep.mubr.msk.bf16.mxu0 %vm2273_vm0, %v2272_v1 }
 0x3e3   :  { %v2127_v58 = vpop.f32.mrb[45].mxu0 }
 0x3e4   :  { %v1344_v59 = vpop.f32.mrb[46].mxu0 }
 0x3e5   :  { %v2128_v60 = vpop.f32.mrb[47].mxu0 }
 0x3e6   :  { %v1387_v61 = vpop.f32.mrb[44].mxu1 }
 0x3e7   :  { %v1578_v63 = vpack.c.bf16 %v1387_v61, %v1341_v57  ;;  %v2133_v0 = vpop.f32.mrb[45].mxu1 }
 0x3e8   :  { %v1390_v2 = vpop.f32.mrb[46].mxu1 }
 0x3e9   :  { %v2134_v3 = vpop.f32.mrb[47].mxu1  ;;  %2168 = vmatmul.mubr.msk.bf16.vlgmr.msra.gmra.mrb[56].mxu1 %vm734_vm2, %v1578_v63 }
 0x3ea   :  { %v1433_v4 = vpop.f32.mrb[48].mxu0  ;;  %2178 = vmatpush3.bf16.msra.mxu1 %v2215_v62  ;;  %2179 = vmatprep.mubr.msk.bf16.mxu1 %vm2273_vm0, %v2272_v1 }
 0x3eb   :  { %v2139_v5 = vpop.f32.mrb[49].mxu0 }
 0x3ec   :  { %v1436_v6 = vpop.f32.mrb[50].mxu0 }
 0x3ed   :  { %v2140_v7 = vpop.f32.mrb[51].mxu0 }
 0x3ee   :  { %v1479_v8 = vpop.f32.mrb[48].mxu1 }
 0x3ef   :  { %v1579_v9 = vpack.c.bf16 %v1479_v8, %v1433_v4  ;;  %v2145_v10 = vpop.f32.mrb[49].mxu1 }
 0x3f0   :  { %v1482_v11 = vpop.f32.mrb[50].mxu1 }
 0x3f1   :  { %v2146_v12 = vpop.f32.mrb[51].mxu1  ;;  %2174 = vmatmul.mubr.msk.bf16.vlgmr.msra.gmra.mrb[60].mxu0 %vm734_vm2, %v1579_v9 }
 0x3f2   :  { %v1525_v13 = vpop.f32.mrb[52].mxu0 }
 0x3f3   :  { %v2151_v14 = vpop.f32.mrb[53].mxu0 }
 0x3f4   :  { %v1528_v15 = vpop.f32.mrb[54].mxu0 }
 0x3f5   :  { %v2152_v16 = vpop.f32.mrb[55].mxu0 }
 0x3f6   :  { %v1571_v17 = vpop.f32.mrb[52].mxu1 }
 0x3f7   :  { %v1580_v18 = vpack.c.bf16 %v1571_v17, %v1525_v13  ;;  %v2157_v19 = vpop.f32.mrb[53].mxu1 }
 0x3f8   :  { %v1574_v20 = vpop.f32.mrb[54].mxu1 }
 0x3f9   :  { %v2158_v21 = vpop.f32.mrb[55].mxu1  ;;  %2180 = vmatmul.mubr.msk.bf16.vlgmr.msra.gmra.mrb[60].mxu1 %vm734_vm2, %v1580_v18 }
 0x4b4   :  { %v1632_v1 = vpop.f32.mrb[56].mxu0 }
 0x4b5   :  { %v2163_v22 = vpop.f32.mrb[57].mxu0  ;;  %v1789_v26 = vsel %vm82_vm1, %v1632_v1, 0.0 }
 0x4b6   :  { %v1635_v23 = vpop.f32.mrb[58].mxu0 }
 0x4b7   :  { %v2164_v24 = vpop.f32.mrb[59].mxu0  ;;  %v1796_v30 = vsel %vm82_vm1, %v1635_v23, 0.0 }
 0x4bc   :  { %v1682_v25 = vpop.f32.mrb[56].mxu1 }
 0x4bd   :  { %v1790_v27 = vsel %vm82_vm1, %v1682_v25, 0.0  ;;  %v2169_v33 = vpop.f32.mrb[57].mxu1 }
 0x4be   :  { %v1791_v28 = vadd.f32 %v1790_v27, %v1789_v26  ;;  %v1685_v29 = vpop.f32.mrb[58].mxu1 }
 0x4bf   :  { %v1797_v31 = vsel %vm82_vm1, %v1685_v29, 0.0  ;;  %v2170_v36 = vpop.f32.mrb[59].mxu1 }
 0x4c0   :  { %v1798_v32 = vadd.f32 %v1797_v31, %v1796_v30 }
 0x4c4   :  { %v1732_v34 = vpop.f32.mrb[60].mxu0 }
 0x4c5   :  { %v1792_v42 = vsel %vm82_vm1, %v1732_v34, 0.0  ;;  %v2175_v35 = vpop.f32.mrb[61].mxu0 }
 0x4c6   :  { %v1793_v37 = vadd.f32 %v1792_v42, %v1791_v28  ;;  %v1735_v38 = vpop.f32.mrb[62].mxu0 }
 0x4c7   :  { %v1799_v39 = vsel %vm82_vm1, %v1735_v38, 0.0  ;;  %v2176_v48 = vpop.f32.mrb[63].mxu0 }
 0x4c8   :  { %v1800_v40 = vadd.f32 %v1799_v39, %v1798_v32 }
 0x4cc   :  { %v1782_v41 = vpop.f32.mrb[60].mxu1 }
 0x4cd   :  { %v1794_v49 = vsel %vm82_vm1, %v1782_v41, 0.0  ;;  %v2181_v43 = vpop.f32.mrb[61].mxu1 }
 0x4ce   :  { %v1795_v44 = vadd.f32 %v1794_v49, %v1793_v37  ;;  %v1785_v45 = vpop.f32.mrb[62].mxu1 }
 0x4cf   :  { %v1801_v46 = vsel %vm82_vm1, %v1785_v45, 0.0  ;;  %v2182_v47 = vpop.f32.mrb[63].mxu1 }
 0x4d0   :  { %v1810_v50 = vadd.f32 %v1890_v52, %v1795_v44  ;;  %v1802_v51 = vadd.f32 %v1801_v46, %v1800_v40 }
 0x4d2   :  { %1812 = vst.msk [vmem:[#allocation2] sm:$0xff] %vm82_vm1, %v1810_v50  ;;  %v1811_v53 = vadd.f32 %v1890_v52, %v1802_v51 }
 0x4d4   :  { %1813 = vst.msk [vmem:[#allocation2 + $0x8] sm:$0xff] %vm82_vm1, %v1811_v53 }
 0x4d5   :  { %2259 = shalt.err (!%p2256_p4)
}
 0x4d6   :  { %s2260_s25 = scalar_lea.hbm %s2645_s4, 256 }
 0x4d7   :  { %p2261_p5 = scmp.ne.s32.totalorder %s2645_s4, %s2260_s25  ;;  %p2264_p6 = scmp.lt.u32.totalorder %s2260_s25, %s2645_s4 }
 0x4d9   :  { %p2266_p7 = pnand %p2264_p6, %p2261_p5 }
 0x4db   :  { %2269 = shalt.err (!%p2266_p7)
}
 0x4dc   :  { %s2275_s29 = smov 128   ;;  %s2276_s30 = smov 8  }
 0x4dd   :  { %1825 = dma.vmem_to_hbm [thread:$0]  %s1820_s22, 256, %s2645_s4, [#allocation3], %s2275_s29, %s2275_s29, %s2276_s30  }
 0x4de   :  { %2270 = dma.done.wait [#allocation3], 256  }
 0x4df   :  { %2271 = vsyncadd [#allocation3], 4294967040 }
 0x4e0   :  { %1829 = vsyncpa [#allocation3], 1 }

</bundles_post_ra>
